<compile_context>
chip_gen: v5e
topology: v5e:2x2
jax: 0.10.0
libtpu: 0.0.40
codegen_flags: <defaults>
</compile_context>

<pallas_src>
import functools

import jax
import jax.numpy as jnp
from jax.experimental import pallas as pl
from jax.experimental.pallas import tpu as pltpu


def _mhsa_kernel(*refs, heads, nb, scale, has_mask):
    if has_mask:
        (q_ref, k_ref, v_ref, mask_ref,
         wqT_ref, wkT_ref, wvT_ref, woT_ref, bo_ref, o_ref) = refs
    else:
        (q_ref, k_ref, v_ref,
         wqT_ref, wkT_ref, wvT_ref, woT_ref, bo_ref, o_ref) = refs
        mask_ref = None

    G, Lq, D = q_ref.shape          # G = nb * heads (batch*head groups per step)
    _, Lk, _ = k_ref.shape
    E = o_ref.shape[-1]

    # ---- per-head linear projections (same (D, D) weight for every head) ----
    # Collapse leading dims so each projection is one fat (G*L, D) @ (D, D)
    # MXU matmul instead of many per-head / small-M matmuls.
    qp = jnp.dot(q_ref[...].reshape(G * Lq, D), wqT_ref[...],
                 preferred_element_type=jnp.float32).reshape(G, Lq, D)
    kp = jnp.dot(k_ref[...].reshape(G * Lk, D), wkT_ref[...],
                 preferred_element_type=jnp.float32).reshape(G, Lk, D)
    vp = jnp.dot(v_ref[...].reshape(G * Lk, D), wvT_ref[...],
                 preferred_element_type=jnp.float32).reshape(G, Lk, D)

    # Fold the 1/sqrt(embed_size) softmax scale into q: G*Lq*D multiplies
    # instead of G*Lq*Lk, and mathematically identical (masked logits stay at
    # -1e20, which behaves as -inf under softmax either way).
    qp = qp * scale

    # ---- attention scores per (batch, head) group ----
    scores = jnp.einsum("gqd,gkd->gqk", qp, kp,
                        preferred_element_type=jnp.float32)        # (G, Lq, Lk)
    if has_mask:
        scores = jnp.where(mask_ref[...] == 0.0, -1e20, scores)    # masked_fill

    # numerically stable softmax over keys
    m = jnp.max(scores, axis=-1, keepdims=True)
    p = jnp.exp(scores - m)
    p = p / jnp.sum(p, axis=-1, keepdims=True)

    ctx = jnp.einsum("gqk,gkd->gqd", p, vp,
                     preferred_element_type=jnp.float32)           # (G, Lq, D)

    # ---- fc_out: mix heads back into the embed dim ----
    # out[b] = sum_h ctx[b, h] @ Wo^T[h*D:(h+1)*D, :] + bias
    # Expressed as `heads` fat (nb*Lq, D) @ (D, E) matmuls: batch samples are
    # fused into the M dim, only the (tiny, static) head loop is unrolled, and
    # no in-kernel transpose is required.
    ctx4 = ctx.reshape(nb, heads, Lq, D)
    acc = jnp.zeros((nb * Lq, E), jnp.float32)
    for h in range(heads):
        acc = acc + jnp.dot(ctx4[:, h].reshape(nb * Lq, D), woT_ref[h],
                            preferred_element_type=jnp.float32)
    acc = acc + bo_ref[...]                                        # (1, E) bias bcast
    o_ref[...] = acc.reshape(nb, Lq, E).astype(o_ref.dtype)        # single full-tile store


def mhsa_pallas(values, keys, query, mask, w_v, w_k, w_q, w_o, b_o, *, heads):
    """Pallas forward matching the PyTorch MultiHeadSelfAttention module.

    values/keys/query: (N, L, embed). mask: None or broadcastable to
    (N, heads, Lq, Lk). w_v/w_k/w_q: (head_dim, head_dim) (PyTorch Linear,
    out x in, no bias). w_o: (embed, embed); b_o: (embed,).
    """
    N, Lq, E = query.shape
    Lk = keys.shape[1]
    Lv = values.shape[1]
    H = heads
    assert E % H == 0, "embed_size must be divisible by heads"
    assert Lv == Lk, "key/value lengths must match"
    D = E // H
    f32 = jnp.float32

    # ---- layout plumbing (plain JAX, outside the kernel) ----
    def split_heads(x, L):
        return x.reshape(N, L, H, D).transpose(0, 2, 1, 3).reshape(N * H, L, D).astype(f32)

    q_h = split_heads(query, Lq)
    k_h = split_heads(keys, Lk)
    v_h = split_heads(values, Lv)

    wqT = jnp.transpose(w_q).astype(f32)                        # (D, D): x @ W^T
    wkT = jnp.transpose(w_k).astype(f32)
    wvT = jnp.transpose(w_v).astype(f32)
    woT_h = jnp.transpose(w_o).reshape(H, D, E).astype(f32)     # Wo^T split per head
    bo2 = b_o.reshape(1, E).astype(f32)

    has_mask = mask is not None
    if has_mask:
        mask_f = jnp.broadcast_to(mask.astype(f32), (N, H, Lq, Lk)).reshape(N * H, Lq, Lk)

    # ---- choose samples-per-step (NB) against an explicit VMEM budget ----
    per_sample_bytes = 4 * (H * Lq * D + 2 * H * Lk * D     # q, k, v tiles
                            + Lq * E                        # output tile
                            + 3 * H * Lq * Lk)              # scores/probs/ctx temps
    if has_mask:
        per_sample_bytes += 4 * H * Lq * Lk
    budget = 24 * 1024 * 1024   # leaves double-buffer headroom inside 64 MiB (v7x)
    divisors = [d for d in range(1, N + 1) if N % d == 0]
    fitting = [d for d in divisors if 4 * d * per_sample_bytes <= budget] or [1]
    two_step = [d for d in fitting if N // d >= 2]   # keep >=2 parallel steps (v7x)
    nb = max(two_step) if two_step else max(fitting)
    G = nb * H
    grid = (N // nb,)

    vmem_limit = int(min(64 * 1024 * 1024,
                         max(16 * 1024 * 1024, 6 * nb * per_sample_bytes)))

    in_arrays = [q_h, k_h, v_h]
    in_specs = [
        pl.BlockSpec((G, Lq, D), lambda i: (i, 0, 0)),
        pl.BlockSpec((G, Lk, D), lambda i: (i, 0, 0)),
        pl.BlockSpec((G, Lk, D), lambda i: (i, 0, 0)),
    ]
    if has_mask:
        in_arrays.append(mask_f)
        in_specs.append(pl.BlockSpec((G, Lq, Lk), lambda i: (i, 0, 0)))
    in_arrays += [wqT, wkT, wvT, woT_h, bo2]
    in_specs += [
        pl.BlockSpec((D, D), lambda i: (0, 0)),
        pl.BlockSpec((D, D), lambda i: (0, 0)),
        pl.BlockSpec((D, D), lambda i: (0, 0)),
        pl.BlockSpec((H, D, E), lambda i: (0, 0, 0)),
        pl.BlockSpec((1, E), lambda i: (0, 0)),
    ]

    kernel = functools.partial(_mhsa_kernel, heads=H, nb=nb,
                               scale=1.0 / (float(E) ** 0.5), has_mask=has_mask)

    out = pl.pallas_call(
        kernel,
        out_shape=jax.ShapeDtypeStruct((N, Lq, E), jnp.float32),
        grid_spec=pltpu.PrefetchScalarGridSpec(
            num_scalar_prefetch=0,
            grid=grid,
            in_specs=in_specs,
            out_specs=pl.BlockSpec((nb, Lq, E), lambda i: (i, 0, 0)),
        ),
        compiler_params=pltpu.CompilerParams(
            dimension_semantics=("parallel",),
            vmem_limit_bytes=vmem_limit,
        ),
    )(*in_arrays)
    return out


def mhsa_reference(values, keys, query, mask, w_v, w_k, w_q, w_o, b_o, *, heads):
    # Pure-JAX mirror of the PyTorch forward (HIGHEST precision for a clean check).
    N, Lq, E = query.shape
    Lk = keys.shape[1]
    D = E // heads
    hp = jax.lax.Precision.HIGHEST
    v = jnp.matmul(values.reshape(N, Lk, heads, D), w_v.T, precision=hp)
    k = jnp.matmul(keys.reshape(N, Lk, heads, D), w_k.T, precision=hp)
    q = jnp.matmul(query.reshape(N, Lq, heads, D), w_q.T, precision=hp)
    att = jnp.einsum("nqhd,nkhd->nhqk", q, k, precision=hp)
    if mask is not None:
        att = jnp.where(mask == 0, -1e20, att)
    att = jax.nn.softmax(att / (E ** 0.5), axis=3)
    out = jnp.einsum("nhql,nlhd->nqhd", att, v, precision=hp).reshape(N, Lq, heads * D)
    return jnp.matmul(out, w_o.T, precision=hp) + b_o


if __name__ == "__main__":
    N, L, E, H = 2, 8, 32, 4
    D = E // H

    root = jax.random.PRNGKey(0)
    kv, kk, kq, k1, k2, k3, k4, k5, km = jax.random.split(root, 9)

    values = jax.random.normal(kv, (N, L, E), dtype=jnp.float32)
    keys = jax.random.normal(kk, (N, L, E), dtype=jnp.float32)
    query = jax.random.normal(kq, (N, L, E), dtype=jnp.float32)

    w_v = jax.random.normal(k1, (D, D), dtype=jnp.float32) * 0.3
    w_k = jax.random.normal(k2, (D, D), dtype=jnp.float32) * 0.3
    w_q = jax.random.normal(k3, (D, D), dtype=jnp.float32) * 0.3
    w_o = jax.random.normal(k4, (E, E), dtype=jnp.float32) * 0.2
    b_o = jax.random.normal(k5, (E,), dtype=jnp.float32) * 0.1

    # Loose-ish tolerance only to absorb MXU f32 pass-count differences between
    # the in-kernel matmuls and the XLA reference; real bugs give O(1) errors.
    TOL = 2e-2

    # mask=None path
    out = jax.block_until_ready(
        mhsa_pallas(values, keys, query, None, w_v, w_k, w_q, w_o, b_o, heads=H))
    ref = mhsa_reference(values, keys, query, None, w_v, w_k, w_q, w_o, b_o, heads=H)
    assert out.shape == (N, L, E)
    assert jnp.allclose(out, ref, atol=TOL, rtol=TOL), float(jnp.max(jnp.abs(out - ref)))

    # masked path (padding-style 0/1 mask broadcast over heads)
    mask = (jax.random.uniform(km, (N, 1, L, L)) > 0.2).astype(jnp.float32)
    out_m = jax.block_until_ready(
        mhsa_pallas(values, keys, query, mask, w_v, w_k, w_q, w_o, b_o, heads=H))
    ref_m = mhsa_reference(values, keys, query, mask, w_v, w_k, w_q, w_o, b_o, heads=H)
    assert jnp.allclose(out_m, ref_m, atol=TOL, rtol=TOL), float(jnp.max(jnp.abs(out_m - ref_m)))

    print("KERNEL_OK")
</pallas_src>

<mosaic_0001>
module attributes {stable_mosaic.version = 11 : i64} {
  func.func @_mhsa_kernel(%arg0: i32, %arg1: memref<4x8x8xf32, #tpu.memory_space<vmem>>, %arg2: memref<4x8x8xf32, #tpu.memory_space<vmem>>, %arg3: memref<4x8x8xf32, #tpu.memory_space<vmem>>, %arg4: memref<8x8xf32, #tpu.memory_space<vmem>>, %arg5: memref<8x8xf32, #tpu.memory_space<vmem>>, %arg6: memref<8x8xf32, #tpu.memory_space<vmem>>, %arg7: memref<4x8x32xf32, #tpu.memory_space<vmem>>, %arg8: memref<1x32xf32, #tpu.memory_space<vmem>>, %arg9: memref<1x8x32xf32, #tpu.memory_space<vmem>>) attributes {dimension_semantics = [#tpu.dimension_semantics<parallel>], iteration_bounds = array<i64: 2>, scalar_prefetch = 0 : i64, scratch_operands = 0 : i64, tpu.core_type = #tpu.core_type<tc>, window_params = [{transform_indices = @transform_0, window_bounds = array<i64: 4, 8, 8>}, {transform_indices = @transform_1, window_bounds = array<i64: 4, 8, 8>}, {transform_indices = @transform_2, window_bounds = array<i64: 4, 8, 8>}, {pipeline_mode = #tpu.pipeline_mode<synchronous>, transform_indices = @transform_3, window_bounds = array<i64: 8, 8>}, {pipeline_mode = #tpu.pipeline_mode<synchronous>, transform_indices = @transform_4, window_bounds = array<i64: 8, 8>}, {pipeline_mode = #tpu.pipeline_mode<synchronous>, transform_indices = @transform_5, window_bounds = array<i64: 8, 8>}, {pipeline_mode = #tpu.pipeline_mode<synchronous>, transform_indices = @transform_6, window_bounds = array<i64: 4, 8, 32>}, {pipeline_mode = #tpu.pipeline_mode<synchronous>, transform_indices = @transform_7, window_bounds = array<i64: 1, 32>}, {transform_indices = @transform_8, window_bounds = array<i64: 1, 8, 32>}]} {
    %c0 = arith.constant 0 : index
    %c0_0 = arith.constant 0 : index
    %c0_1 = arith.constant 0 : index
    %0 = vector.load %arg1[%c0, %c0_0, %c0_1] : memref<4x8x8xf32, #tpu.memory_space<vmem>>, vector<4x8x8xf32>
    %1 = vector.shape_cast %0 : vector<4x8x8xf32> to vector<32x8xf32>
    %c0_2 = arith.constant 0 : index
    %c0_3 = arith.constant 0 : index
    %2 = vector.load %arg4[%c0_2, %c0_3] : memref<8x8xf32, #tpu.memory_space<vmem>>, vector<8x8xf32>
    %cst = arith.constant dense<0.000000e+00> : vector<32x8xf32>
    %3 = tpu.matmul %1, %2, %cst {dimension_numbers = #tpu.dot_dimension_numbers<[1], [0], [0], [1], [0, 0, 1, 1], [], []>} : vector<32x8xf32>, vector<8x8xf32>, vector<32x8xf32> -> vector<32x8xf32>
    %4 = vector.shape_cast %3 : vector<32x8xf32> to vector<4x8x8xf32>
    %c0_4 = arith.constant 0 : index
    %c0_5 = arith.constant 0 : index
    %c0_6 = arith.constant 0 : index
    %5 = vector.load %arg2[%c0_4, %c0_5, %c0_6] : memref<4x8x8xf32, #tpu.memory_space<vmem>>, vector<4x8x8xf32>
    %6 = vector.shape_cast %5 : vector<4x8x8xf32> to vector<32x8xf32>
    %c0_7 = arith.constant 0 : index
    %c0_8 = arith.constant 0 : index
    %7 = vector.load %arg5[%c0_7, %c0_8] : memref<8x8xf32, #tpu.memory_space<vmem>>, vector<8x8xf32>
    %cst_9 = arith.constant dense<0.000000e+00> : vector<32x8xf32>
    %8 = tpu.matmul %6, %7, %cst_9 {dimension_numbers = #tpu.dot_dimension_numbers<[1], [0], [0], [1], [0, 0, 1, 1], [], []>} : vector<32x8xf32>, vector<8x8xf32>, vector<32x8xf32> -> vector<32x8xf32>
    %9 = vector.shape_cast %8 : vector<32x8xf32> to vector<4x8x8xf32>
    %c0_10 = arith.constant 0 : index
    %c0_11 = arith.constant 0 : index
    %c0_12 = arith.constant 0 : index
    %10 = vector.load %arg3[%c0_10, %c0_11, %c0_12] : memref<4x8x8xf32, #tpu.memory_space<vmem>>, vector<4x8x8xf32>
    %11 = vector.shape_cast %10 : vector<4x8x8xf32> to vector<32x8xf32>
    %c0_13 = arith.constant 0 : index
    %c0_14 = arith.constant 0 : index
    %12 = vector.load %arg6[%c0_13, %c0_14] : memref<8x8xf32, #tpu.memory_space<vmem>>, vector<8x8xf32>
    %cst_15 = arith.constant dense<0.000000e+00> : vector<32x8xf32>
    %13 = tpu.matmul %11, %12, %cst_15 {dimension_numbers = #tpu.dot_dimension_numbers<[1], [0], [0], [1], [0, 0, 1, 1], [], []>} : vector<32x8xf32>, vector<8x8xf32>, vector<32x8xf32> -> vector<32x8xf32>
    %14 = vector.shape_cast %13 : vector<32x8xf32> to vector<4x8x8xf32>
    %cst_16 = arith.constant 0.176776692 : f32
    %15 = vector.broadcast %cst_16 : f32 to vector<4x8x8xf32>
    %16 = arith.mulf %4, %15 : vector<4x8x8xf32>
    "tpu.trace_start"() <{level = 10 : i32, message = "gqd,gkd->gqk"}> : () -> ()
    %cst_17 = arith.constant dense<0.000000e+00> : vector<4x8x8xf32>
    %17 = tpu.matmul %16, %9, %cst_17 {dimension_numbers = #tpu.dot_dimension_numbers<[2], [2], [1], [1], [0, 0, 0, 1, 1, 1], [0], [0]>} : vector<4x8x8xf32>, vector<4x8x8xf32>, vector<4x8x8xf32> -> vector<4x8x8xf32>
    "tpu.trace_stop"() : () -> ()
    %cst_18 = arith.constant dense<0xFF800000> : vector<4x8xf32>
    %18 = vector.multi_reduction <maximumf>, %17, %cst_18 [2] : vector<4x8x8xf32> to vector<4x8xf32>
    %19 = vector.shape_cast %18 : vector<4x8xf32> to vector<4x8x1xf32>
    %20 = vector.broadcast %19 : vector<4x8x1xf32> to vector<4x8x8xf32>
    %21 = arith.subf %17, %20 : vector<4x8x8xf32>
    %22 = math.exp %21 : vector<4x8x8xf32>
    %cst_19 = arith.constant dense<0.000000e+00> : vector<4x8xf32>
    %23 = vector.multi_reduction <add>, %22, %cst_19 [2] : vector<4x8x8xf32> to vector<4x8xf32>
    %24 = vector.shape_cast %23 : vector<4x8xf32> to vector<4x8x1xf32>
    %25 = vector.broadcast %24 : vector<4x8x1xf32> to vector<4x8x8xf32>
    %26 = arith.divf %22, %25 : vector<4x8x8xf32>
    "tpu.trace_start"() <{level = 10 : i32, message = "gqk,gkd->gqd"}> : () -> ()
    %cst_20 = arith.constant dense<0.000000e+00> : vector<4x8x8xf32>
    %27 = tpu.matmul %26, %14, %cst_20 {dimension_numbers = #tpu.dot_dimension_numbers<[2], [1], [1], [2], [0, 0, 0, 1, 1, 2], [0], [0]>} : vector<4x8x8xf32>, vector<4x8x8xf32>, vector<4x8x8xf32> -> vector<4x8x8xf32>
    "tpu.trace_stop"() : () -> ()
    %28 = vector.shape_cast %27 : vector<4x8x8xf32> to vector<1x4x8x8xf32>
    %cst_21 = arith.constant 0.000000e+00 : f32
    %29 = vector.broadcast %cst_21 : f32 to vector<8x32xf32>
    %30 = vector.extract_strided_slice %28 {offsets = [0, 0, 0, 0], sizes = [1, 1, 8, 8], strides = [1, 1, 1, 1]} : vector<1x4x8x8xf32> to vector<1x1x8x8xf32>
    %31 = vector.shape_cast %30 : vector<1x1x8x8xf32> to vector<1x8x8xf32>
    %32 = vector.shape_cast %31 : vector<1x8x8xf32> to vector<8x8xf32>
    %c0_22 = arith.constant 0 : index
    %c0_23 = arith.constant 0 : index
    %c0_24 = arith.constant 0 : index
    %33 = vector.load %arg7[%c0_22, %c0_23, %c0_24] : memref<4x8x32xf32, #tpu.memory_space<vmem>>, vector<1x8x32xf32>
    %34 = vector.shape_cast %33 : vector<1x8x32xf32> to vector<8x32xf32>
    %cst_25 = arith.constant dense<0.000000e+00> : vector<8x32xf32>
    %35 = tpu.matmul %32, %34, %cst_25 {dimension_numbers = #tpu.dot_dimension_numbers<[1], [0], [0], [1], [0, 0, 1, 1], [], []>} : vector<8x8xf32>, vector<8x32xf32>, vector<8x32xf32> -> vector<8x32xf32>
    %36 = arith.addf %29, %35 : vector<8x32xf32>
    %37 = vector.extract_strided_slice %28 {offsets = [0, 1, 0, 0], sizes = [1, 1, 8, 8], strides = [1, 1, 1, 1]} : vector<1x4x8x8xf32> to vector<1x1x8x8xf32>
    %38 = vector.shape_cast %37 : vector<1x1x8x8xf32> to vector<1x8x8xf32>
    %39 = vector.shape_cast %38 : vector<1x8x8xf32> to vector<8x8xf32>
    %c1 = arith.constant 1 : index
    %c0_26 = arith.constant 0 : index
    %c0_27 = arith.constant 0 : index
    %40 = vector.load %arg7[%c1, %c0_26, %c0_27] : memref<4x8x32xf32, #tpu.memory_space<vmem>>, vector<1x8x32xf32>
    %41 = vector.shape_cast %40 : vector<1x8x32xf32> to vector<8x32xf32>
    %cst_28 = arith.constant dense<0.000000e+00> : vector<8x32xf32>
    %42 = tpu.matmul %39, %41, %cst_28 {dimension_numbers = #tpu.dot_dimension_numbers<[1], [0], [0], [1], [0, 0, 1, 1], [], []>} : vector<8x8xf32>, vector<8x32xf32>, vector<8x32xf32> -> vector<8x32xf32>
    %43 = arith.addf %36, %42 : vector<8x32xf32>
    %44 = vector.extract_strided_slice %28 {offsets = [0, 2, 0, 0], sizes = [1, 1, 8, 8], strides = [1, 1, 1, 1]} : vector<1x4x8x8xf32> to vector<1x1x8x8xf32>
    %45 = vector.shape_cast %44 : vector<1x1x8x8xf32> to vector<1x8x8xf32>
    %46 = vector.shape_cast %45 : vector<1x8x8xf32> to vector<8x8xf32>
    %c2 = arith.constant 2 : index
    %c0_29 = arith.constant 0 : index
    %c0_30 = arith.constant 0 : index
    %47 = vector.load %arg7[%c2, %c0_29, %c0_30] : memref<4x8x32xf32, #tpu.memory_space<vmem>>, vector<1x8x32xf32>
    %48 = vector.shape_cast %47 : vector<1x8x32xf32> to vector<8x32xf32>
    %cst_31 = arith.constant dense<0.000000e+00> : vector<8x32xf32>
    %49 = tpu.matmul %46, %48, %cst_31 {dimension_numbers = #tpu.dot_dimension_numbers<[1], [0], [0], [1], [0, 0, 1, 1], [], []>} : vector<8x8xf32>, vector<8x32xf32>, vector<8x32xf32> -> vector<8x32xf32>
    %50 = arith.addf %43, %49 : vector<8x32xf32>
    %51 = vector.extract_strided_slice %28 {offsets = [0, 3, 0, 0], sizes = [1, 1, 8, 8], strides = [1, 1, 1, 1]} : vector<1x4x8x8xf32> to vector<1x1x8x8xf32>
    %52 = vector.shape_cast %51 : vector<1x1x8x8xf32> to vector<1x8x8xf32>
    %53 = vector.shape_cast %52 : vector<1x8x8xf32> to vector<8x8xf32>
    %c3 = arith.constant 3 : index
    %c0_32 = arith.constant 0 : index
    %c0_33 = arith.constant 0 : index
    %54 = vector.load %arg7[%c3, %c0_32, %c0_33] : memref<4x8x32xf32, #tpu.memory_space<vmem>>, vector<1x8x32xf32>
    %55 = vector.shape_cast %54 : vector<1x8x32xf32> to vector<8x32xf32>
    %cst_34 = arith.constant dense<0.000000e+00> : vector<8x32xf32>
    %56 = tpu.matmul %53, %55, %cst_34 {dimension_numbers = #tpu.dot_dimension_numbers<[1], [0], [0], [1], [0, 0, 1, 1], [], []>} : vector<8x8xf32>, vector<8x32xf32>, vector<8x32xf32> -> vector<8x32xf32>
    %57 = arith.addf %50, %56 : vector<8x32xf32>
    %c0_35 = arith.constant 0 : index
    %c0_36 = arith.constant 0 : index
    %58 = vector.load %arg8[%c0_35, %c0_36] : memref<1x32xf32, #tpu.memory_space<vmem>>, vector<1x32xf32>
    %59 = vector.broadcast %58 : vector<1x32xf32> to vector<8x32xf32>
    %60 = arith.addf %57, %59 : vector<8x32xf32>
    %61 = vector.shape_cast %60 : vector<8x32xf32> to vector<1x8x32xf32>
    %c0_37 = arith.constant 0 : index
    %c0_38 = arith.constant 0 : index
    %c0_39 = arith.constant 0 : index
    %62 = vector.load %arg9[%c0_37, %c0_38, %c0_39] : memref<1x8x32xf32, #tpu.memory_space<vmem>>, vector<1x8x32xf32>
    tpu.vector_store %arg9[%c0_37, %c0_38, %c0_39], %61 {strides = array<i32>} : memref<1x8x32xf32, #tpu.memory_space<vmem>>, vector<1x8x32xf32>,
    return
  }
  func.func @transform_0(%arg0: i32) -> (i32, i32, i32) {
    %c0_i32 = arith.constant 0 : i32
    %c0_i32_0 = arith.constant 0 : i32
    %c0_i32_1 = arith.constant 0 : i32
    return %arg0, %c0_i32, %c0_i32_0 : i32, i32, i32
  }
  func.func @transform_1(%arg0: i32) -> (i32, i32, i32) {
    %c0_i32 = arith.constant 0 : i32
    %c0_i32_0 = arith.constant 0 : i32
    %c0_i32_1 = arith.constant 0 : i32
    return %arg0, %c0_i32, %c0_i32_0 : i32, i32, i32
  }
  func.func @transform_2(%arg0: i32) -> (i32, i32, i32) {
    %c0_i32 = arith.constant 0 : i32
    %c0_i32_0 = arith.constant 0 : i32
    %c0_i32_1 = arith.constant 0 : i32
    return %arg0, %c0_i32, %c0_i32_0 : i32, i32, i32
  }
  func.func @transform_3(%arg0: i32) -> (i32, i32) {
    %c0_i32 = arith.constant 0 : i32
    %c0_i32_0 = arith.constant 0 : i32
    %c0_i32_1 = arith.constant 0 : i32
    return %c0_i32, %c0_i32_0 : i32, i32
  }
  func.func @transform_4(%arg0: i32) -> (i32, i32) {
    %c0_i32 = arith.constant 0 : i32
    %c0_i32_0 = arith.constant 0 : i32
    %c0_i32_1 = arith.constant 0 : i32
    return %c0_i32, %c0_i32_0 : i32, i32
  }
  func.func @transform_5(%arg0: i32) -> (i32, i32) {
    %c0_i32 = arith.constant 0 : i32
    %c0_i32_0 = arith.constant 0 : i32
    %c0_i32_1 = arith.constant 0 : i32
    return %c0_i32, %c0_i32_0 : i32, i32
  }
  func.func @transform_6(%arg0: i32) -> (i32, i32, i32) {
    %c0_i32 = arith.constant 0 : i32
    %c0_i32_0 = arith.constant 0 : i32
    %c0_i32_1 = arith.constant 0 : i32
    %c0_i32_2 = arith.constant 0 : i32
    return %c0_i32, %c0_i32_0, %c0_i32_1 : i32, i32, i32
  }
  func.func @transform_7(%arg0: i32) -> (i32, i32) {
    %c0_i32 = arith.constant 0 : i32
    %c0_i32_0 = arith.constant 0 : i32
    %c0_i32_1 = arith.constant 0 : i32
    return %c0_i32, %c0_i32_0 : i32, i32
  }
  func.func @transform_8(%arg0: i32) -> (i32, i32, i32) {
    %c0_i32 = arith.constant 0 : i32
    %c0_i32_0 = arith.constant 0 : i32
    %c0_i32_1 = arith.constant 0 : i32
    return %arg0, %c0_i32, %c0_i32_0 : i32, i32, i32
  }
}

</mosaic_0001>

<bundles_post_ra>
// kernel: tpu_custom_call.1
= control target key start
LH: loop header
LB: loop body
LE: loop exit
PB: predicated region body
PF: predicated region fallthrough
CT: control target
= control target key end

     0   :  { %s1991_s0 = inlined_call_operand.hbm [shape: f32[8,8,8], index: 0, kind: input, shape index: {}]   ;;  %s1992_s1 = inlined_call_operand.hbm [shape: f32[8,8,8], index: 1, kind: input, shape index: {}]   ;;  %s1993_s2 = inlined_call_operand.hbm [shape: f32[8,8,8], index: 2, kind: input, shape index: {}]   ;;  %s1994_s3 = inlined_call_operand.hbm [shape: f32[8,8], index: 3, kind: input, shape index: {}]   ;;  %s1995_s4 = inlined_call_operand.hbm [shape: f32[8,8], index: 4, kind: input, shape index: {}]   ;;  %s1996_s5 = inlined_call_operand.hbm [shape: f32[8,8], index: 5, kind: input, shape index: {}]   ;;  %s1997_s6 = inlined_call_operand.hbm [shape: f32[4,8,32], index: 6, kind: input, shape index: {}]   ;;  %s1998_s7 = inlined_call_operand.vmem [shape: f32[1,32], index: 7, kind: input, shape index: {}]   ;;  %s1999_s8 = inlined_call_operand.hbm [shape: f32[2,8,32], index: 8, kind: output, shape index: {}]  }
   0x1   :  { %2007 = sst [smem:[#allocation25_spill]] %s1992_s1 }
   0x2   :  { %2008 = sst [smem:[#allocation26_spill]] %s1994_s3 }
   0x3   :  { %2009 = sst [smem:[#allocation27_spill]] %s1996_s5 }
   0x4   :  { %13 = vsyncpa [#allocation3], 0 }
   0x5   :  { %15 = vsyncpa [#allocation3 + $0x1], 0 }
   0x6   :  { %16 = vsyncpa [#allocation6], 0 }
   0x7   :  { %18 = vsyncpa [#allocation6 + $0x1], 0 }
   0x8   :  { %19 = vsyncpa [#allocation9], 0 }
   0x9   :  { %20 = vsyncpa [#allocation12], 0 }
   0xa   :  { %21 = vsyncpa [#allocation4], 0 }
   0xb   :  { %23 = vsyncpa [#allocation4 + $0x1], 0  ;;  %s1697_s27 = smov 0   ;;  %s1699_s28 = smov 0  }
   0xc   :  { %s1701_s29 = smov 0   ;;  %s1703_s30 = smov 0  }
   0xd LB: > { %2010 = sst [smem:[#allocation20_spill]] %s1632_s27  ;;  %s1718_s9 = sadd.s32 4294967295, %s1644_s30   ;;  %s1644_s30 = sphi %s1703_s30, %s2033_s30   ;;  %s1640_s29 = sphi %s1701_s29, %s2037_s29   ;;  %s1636_s28 = sphi %s1699_s28, %s2036_s28   ;;  %s1632_s27 = sphi %s1697_s27, %s2035_s27  }
   0xe   : > { %2011 = sst [smem:[#allocation21_spill]] %s1644_s30  ;;  %s1180_s10 = sadd.s32 4294967294, %s1644_s30  }
   0xf   : > { %p49_p0 = scmp.ne.s32.totalorder %s1636_s28, %s1632_s27  ;;  %p2003_p1 = scmp.eq.s32.totalorder %s1718_s9, 0 }
  0x10   : > { %p230_p2 = scmp.eq.s32.totalorder %s1718_s9, 1  ;;  %p236_p3 = scmp.eq.s32.totalorder %s1180_s10, 1 }
  0x11   : > { %p1727_p4 = por %p2003_p1, %p49_p0  ;;  %p1181_p5 = scmp.ge.s32.totalorder %s1644_s30, 1 }
  0x12   : > { %p1732_p6 = por %p236_p3, %p49_p0  ;;  %p243_p7 = scmp.lt.s32.totalorder %s1644_s30, 3 }
  0x13   : > { %s2015_s3 = sld [smem:[#allocation26_spill]]  ;;  %s1646_s17 = smov [#allocation8]  }
  0x14   : > { %s2013_s12 = scalar_select %p1732_p6, 1, 0 }
  0x15   : > { %p1740_p8 = pnand %p1181_p5, %p243_p7  ;;  %s257_s18 = sshll.u32 %s1646_s17, 4  ;;  %s258_s18 = int_to_ptr.vmem [resolvable:$true] %s257_s18 }
  0x16   : > { %2014 = sst [smem:[#allocation22_spill]] %s2013_s12  ;;  %s1647_s23 = smov [#allocation11]  }
  0x17   : > { %p1264_p10 = pneg %p1740_p8  ;;  %s2017_s5 = sld [smem:[#allocation27_spill]] }
  0x18   : > { %s281_s24 = sshll.u32 %s1647_s23, 4  ;;  %s1761_s25 = sadd.s32 1, %s1644_s30   ;;  %s282_s24 = int_to_ptr.vmem [resolvable:$true] %s281_s24 }
  0x19   : > { %s255_s15 = sshll.u32 %s2015_s3, 4  ;;  %p1752_p11 = pnand %p1264_p10, %p2003_p1  ;;  %s256_s15 = int_to_ptr.hbm [resolvable:$true] %s255_s15 }
  0x1a   : > { %2019 = sst [smem:[#allocation23_spill]] %s1761_s25  ;;  %s36_s26 = sadd.s32 1, %s1640_s29 }
  0x1b   : > { %1267 = dma.hbm_to_vmem [thread:$0]  (!%p1752_p11), %s256_s15, 128, %s258_s18, [#allocation9]  }
  0x1c   : > { %s33_s10 = ssub.s32 %s1644_s30, %s1761_s25  ;;  %p43_p12 = scmp.ne.s32.totalorder %s1640_s29, %s1636_s28 }
  0x1d   : > { %s279_s21 = sshll.u32 %s2017_s5, 4  ;;  %p34_p13 = scmp.eq.s32.totalorder %s33_s10, 0  ;;  %s280_s21 = int_to_ptr.hbm [resolvable:$true] %s279_s21 }
  0x1e   : > { %1273 = dma.hbm_to_vmem [thread:$0]  (!%p1752_p11), %s280_s21, 128, %s282_s24, [#allocation12]  }
  0x1f   : > { %p44_p0 = scmp.eq.s32.totalorder %s1644_s30, 0  ;;  %p1771_p3 = por %p230_p2, %p43_p12 }
  0x20   : > { %s1776_s14 = scalar_select %p34_p13, %s1640_s29, %s36_s26  }
  0x21   : > { %p45_p5 = por %p44_p0, %p43_p12  ;;  %p1295_p7 = scmp.lt.s32.totalorder %s1644_s30, 2 }
  0x22   : > { %2021 = sst [smem:[#allocation24_spill]] %s1776_s14  ;;  %s2000_s15 = sand.u32 1, %s1640_s29  }
  0x23   : > { %s1782_s17 = sshll.u32 %s2000_s15, 5  ;;  %s1785_s18 = sshll.u32 %s1644_s30, 5 }
  0x24   : > { %p1787_p10 = pnand %p1295_p7, %p45_p5  ;;  %s331_s20 = sand.u32 1, %s1644_s30  }
  0x25   : > { %s2023_s1 = sld [smem:[#allocation25_spill]]  ;;  %s335_s10 = scalar_lea.vmem [#allocation5], %s1782_s17 }
  0x26   : > { %s343_s3 = sshll.u32 %s335_s10, 4  ;;  %s1797_s15 = scalar_lea.sflag [#allocation6], %s331_s20  ;;  %s344_s3 = int_to_ptr.vmem [resolvable:$true] %s343_s3 }
  0x27   : > { %p1420_p12 = pneg %p1787_p10 }
  0x2b   : > { %s340_s24 = scalar_lea.hbm %s2023_s1, %s1785_s18  ;;  %s1423_s23 = scalar_lea.hbm %s2023_s1, 64 }
  0x2c   : > { %s341_s26 = sshll.u32 %s340_s24, 4  ;;  %s342_s26 = int_to_ptr.hbm [resolvable:$true] %s341_s26 }
  0x2d   : > { %s1416_s5 = sshra.s32 %s342_s26, 4  ;;  %s1417_s5 = int_to_ptr.hbm [resolvable:$true] %s1416_s5 }
  0x2e   : > { %s1418_s14 = scalar_lea.hbm %s1417_s5, 32  ;;  %p1424_p5 = scmp.lt.s32.totalorder %s1417_s5, %s2023_s1 }
  0x2f   : > { %p1419_p2 = scmp.ne.s32.totalorder %s1417_s5, %s1418_s14  ;;  %p1425_p7 = scmp.lt.s32.totalorder %s1423_s23, %s1418_s14 }
  0x31   : > { %p1421_p13 = pnand %p1420_p12, %p1419_p2  ;;  %p1426_p9 = por %p1425_p7, %p1424_p5 }
  0x33   : > { %p1422_p0 = pneg %p1421_p13 }
  0x35   : > { %p1427_p1 = pnand %p1426_p9, %p1422_p0 }
  0x37   : > { %1430 = shalt.err (!%p1427_p1)
}
  0x38   : > { %s1648_s20 = smov 128   ;;  %s1649_s30 = smov 8  }
  0x39   : > { %1283 = dma.hbm_to_vmem [thread:$0]  (!%p1787_p10), %s342_s26, 512, %s344_s3, %s1797_s15, %s1648_s20, %s1648_s20, %s1649_s30  }
  0x3a   : > { %s267_s5 = sshll.u32 %s1995_s4, 4  ;;  %s1650_s14 = smov [#allocation10]   ;;  %s268_s5 = int_to_ptr.hbm [resolvable:$true] %s267_s5 }
  0x3b   : > { %s269_s23 = sshll.u32 %s1650_s14, 4  ;;  %s290_s1 = sshll.u32 %s1997_s6, 4  ;;  %s270_s23 = int_to_ptr.vmem [resolvable:$true] %s269_s23  ;;  %s291_s1 = int_to_ptr.hbm [resolvable:$true] %s290_s1 }
  0x3c   : > { %1270 = dma.hbm_to_vmem [thread:$0]  (!%p1752_p11), %s268_s5, 128, %s270_s23, [#allocation9]  }
  0x3d   : > { %s1651_s12 = smov [#allocation13]   ;;  %s318_s25 = scalar_lea.hbm %s1991_s0, %s1785_s18 }
  0x3e   : > { %s292_s27 = sshll.u32 %s1651_s12, 4  ;;  %s313_s21 = scalar_lea.vmem [#allocation2], %s1782_s17  ;;  %s293_s27 = int_to_ptr.vmem [resolvable:$true] %s292_s27 }
  0x3f   : > { %1276 = dma.hbm_to_vmem [thread:$0]  (!%p1752_p11), %s291_s1, 512, %s293_s27, [#allocation12], %s1648_s20, %s1648_s20, %s1649_s30  }
  0x40   : > { %s321_s14 = sshll.u32 %s313_s21, 4  ;;  %s319_s24 = sshll.u32 %s318_s25, 4  ;;  %s322_s14 = int_to_ptr.vmem [resolvable:$true] %s321_s14  ;;  %s320_s24 = int_to_ptr.hbm [resolvable:$true] %s319_s24 }
  0x41   : > { %s2024_s5 = sand.u32 1, %s1640_s29   ;;  %s1506_s10 = sshra.s32 %s320_s24, 4  ;;  %s1507_s10 = int_to_ptr.hbm [resolvable:$true] %s1506_s10 }
  0x42   : > { %s310_s23 = scalar_lea.sflag [#allocation3], %s2024_s5  ;;  %s1508_s12 = scalar_lea.hbm %s1507_s10, 32 }
  0x43   : > { %p1509_p1 = scmp.ne.s32.totalorder %s1507_s10, %s1508_s12  ;;  %s1513_s22 = scalar_lea.hbm %s1991_s0, 64 }
  0x44   : > { %p1514_p11 = scmp.lt.s32.totalorder %s1507_s10, %s1991_s0  ;;  %p1515_p13 = scmp.lt.s32.totalorder %s1513_s22, %s1508_s12 }
  0x45   : > { %p1511_p9 = pnand %p1509_p1, %p1420_p12 }
  0x46   : > { %p1516_p0 = por %p1515_p13, %p1514_p11 }
  0x47   : > { %p1512_p2 = pneg %p1511_p9 }
  0x49   : > { %p1517_p5 = pnand %p1516_p0, %p1512_p2 }
  0x4b   : > { %1520 = shalt.err (!%p1517_p5)
}
  0x4c   : > { %1280 = dma.hbm_to_vmem [thread:$0]  (!%p1787_p10), %s320_s24, 512, %s322_s14, %s310_s23, %s1648_s20, %s1648_s20, %s1649_s30  }
  0x4d   : > { %s362_s5 = scalar_lea.hbm %s1993_s2, %s1785_s18  ;;  %s357_s1 = scalar_lea.vmem [#allocation7], %s1782_s17 }
  0x4e   : > { %s365_s27 = sshll.u32 %s357_s1, 4  ;;  %s363_s10 = sshll.u32 %s362_s5, 4  ;;  %s366_s27 = int_to_ptr.vmem [resolvable:$true] %s365_s27  ;;  %s364_s10 = int_to_ptr.hbm [resolvable:$true] %s363_s10 }
  0x4f   : > { %s1536_s12 = sshra.s32 %s364_s10, 4  ;;  %s1543_s14 = scalar_lea.hbm %s1993_s2, 64  ;;  %s1537_s12 = int_to_ptr.hbm [resolvable:$true] %s1536_s12 }
  0x50   : > { %s1538_s22 = scalar_lea.hbm %s1537_s12, 32  ;;  %p1544_p2 = scmp.lt.s32.totalorder %s1537_s12, %s1993_s2 }
  0x51   : > { %p1539_p7 = scmp.ne.s32.totalorder %s1537_s12, %s1538_s22  ;;  %p1545_p11 = scmp.lt.s32.totalorder %s1543_s14, %s1538_s22 }
  0x53   : > { %p1541_p1 = pnand %p1539_p7, %p1420_p12  ;;  %p1546_p13 = por %p1545_p11, %p1544_p2 }
  0x55   : > { %p1542_p9 = pneg %p1541_p1 }
  0x57   : > { %p1547_p0 = pnand %p1546_p13, %p1542_p9 }
  0x59   : > { %1550 = shalt.err (!%p1547_p0)
}
  0x5a   : > { %1286 = dma.hbm_to_vmem [thread:$0]  (!%p1787_p10), %s364_s10, 512, %s366_s27, %s1797_s15, %s1648_s20, %s1648_s20, %s1649_s30  }
  0x5b   : > { %377 = sbr.rel (%p1740_p8) target bundleno = 928 (0x3a0), region = 52  ;;  %s1873_s17 = sand.u32 (!%p1740_p8), 1, %s1636_s28  }
  0x5c   : > { %s1197_s18 = sshll.u32 (!%p1740_p8), %s1873_s17, 5  ;;  %s380_s25 = scalar_lea.sflag (!%p1740_p8), [#allocation3], %s1873_s17 }
  0x5d   : > { %s1877_s21 = scalar_lea.vmem (!%p1740_p8), [#allocation2], %s1197_s18 }
  0x60   : > { %1611 = dma.done.wait (%p1727_p4), %s380_s25, 512  }
  0x61   : > { %1613 = vsyncadd (%p1727_p4), %s380_s25, 4294966784  ;;  %s389_s30 = sand.u32 1, %s1718_s9   ;;  %s393_s15 = scalar_lea.vmem [#allocation5], %s1197_s18 }
  0x62   : > { %s390_s16 = scalar_lea.sflag [#allocation6], %s389_s30 }
  0x63   : > { %1615 = dma.done.wait (%p1727_p4), %s390_s16, 1024  }
  0x64   : > { %1617 = vsyncadd (%p1727_p4), %s390_s16, 4294966272  ;;  %s1888_s19 = scalar_lea.vmem [#allocation7], %s1197_s18  ;;  %p2025_p8 = scmp.eq.s32.totalorder %s1718_s9, 0 }
  0x66   : > { %1619 = dma.done.wait (%p2025_p8), [#allocation9], 256   ;;  %p2026_p10 = pmov %p2025_p8 }
  0x67   : > { %p2027_p12 = pmov %p2025_p8 }
  0x68   : > { %1621 = vsyncadd (%p2026_p10), [#allocation9], 4294967040 }
  0x69   : > { %1623 = dma.done.wait (%p2027_p12), [#allocation12], 640   ;;  %p2028_p5 = pmov %p2025_p8 }
  0x6a   : > { %vm475_vm0 = vcmask 64512   ;;  %v521_v0 = vld [vmem:[#allocation10] sm:$0xff]  ;;  %v474_v1 = vld [vmem:[#allocation8] sm:$0xff]  ;;  %v519_v6 = vld [vmem:[%s393_s15 + $0x10] sm:$0xff]  ;;  %s1204_s11 = sshll.u32 %s1873_s17, 3  ;;  %s1234_s20 = sshll.u32 %s1718_s9, 3 }
  0x6b   : > { %1625 = vsyncadd (%p2028_p5), [#allocation12], 4294966656  ;;  %v517_v2 = vld [vmem:[%s393_s15] sm:$0xff]  ;;  %549 = vmatpush.msra.mxu1 %v521_v0  ;;  %503 = vmatpush.msra.mxu0 %v474_v1  ;;  %v518_v4 = vld [vmem:[%s393_s15 + $0x8] sm:$0xff]  ;;  %s1024_s27 = scalar_lea.hbm %s1999_s8, %s1234_s20  ;;  %s466_s22 = scalar_lea.vmem [#allocation14], %s1204_s11 }
  0x6c   : > { %v470_v3 = vld [vmem:[%s1877_s21] sm:$0xff]  ;;  %1209 = vmatmul.msk.f32.vlgmr.msra.gmra.mxu1 %vm475_vm0, %v517_v2  ;;  %v471_v5 = vld [vmem:[%s1877_s21 + $0x8] sm:$0xff]  ;;  %v472_v7 = vld [vmem:[%s1877_s21 + $0x10] sm:$0xff]  ;;  %s1026_s3 = sshll.u32 %s466_s22, 4  ;;  %s1028_s26 = sshll.u32 %s1024_s27, 4  ;;  %s1027_s3 = int_to_ptr.vmem [resolvable:$true] %s1026_s3  ;;  %s1029_s26 = int_to_ptr.hbm [resolvable:$true] %s1028_s26 }
  0x6d   : > { %1205 = vmatmul.msk.f32.vlgmr.msra.gmra.mxu0 %vm475_vm0, %v470_v3  ;;  %v520_v8 = vld [vmem:[%s393_s15 + $0x18] sm:$0xff]  ;;  %v567_v22 = vld [vmem:[#allocation11] sm:$0xff]  ;;  %v563_v23 = vld [vmem:[%s1888_s19] sm:$0xff]  ;;  %s1014_s9 = scalar_lea.sflag [#allocation4], %s1873_s17  ;;  %s1580_s14 = sshra.s32 %s1029_s26, 4  ;;  %s1581_s14 = int_to_ptr.hbm [resolvable:$true] %s1580_s14 }
  0x6e   : > { %v473_v9 = vld [vmem:[%s1877_s21 + $0x18] sm:$0xff]  ;;  %595 = vmatpush.msra.mxu2 %v567_v22  ;;  %v564_v32 = vld [vmem:[%s1888_s19 + $0x8] sm:$0xff]  ;;  %v565_v33 = vld [vmem:[%s1888_s19 + $0x10] sm:$0xff]  ;;  %s1582_s24 = scalar_lea.hbm %s1581_s14, 8  ;;  %s1586_s25 = scalar_lea.hbm %s1999_s8, 16 }
  0x6f   : > { %1213 = vmatmul.msk.f32.vlgmr.msra.gmra.mxu2 %vm475_vm0, %v563_v23  ;;  %v566_v34 = vld [vmem:[%s1888_s19 + $0x18] sm:$0xff]  ;;  %p1583_p4 = scmp.ne.s32.totalorder %s1581_s14, %s1582_s24  ;;  %p1587_p9 = scmp.lt.s32.totalorder %s1581_s14, %s1999_s8 }
  0x70   : > { %p1588_p2 = scmp.lt.s32.totalorder %s1586_s25, %s1582_s24 }
  0x71   : > { %p1584_p7 = pnand %p1583_p4, %p1771_p3 }
  0x72   : > { %p1589_p11 = por %p1588_p2, %p1587_p9 }
  0x73   : > { %p1585_p1 = pneg %p1584_p7 }
  0x74   : > { %1210 = vmatmul.msk.f32.gmra.mxu1 %vm475_vm0, %v518_v4 }
  0x75   : > { %1206 = vmatmul.msk.f32.gmra.mxu0 %vm475_vm0, %v471_v5  ;;  %p1590_p13 = pnand %p1589_p11, %p1585_p1 }
  0x77   : > { %1214 = vmatmul.msk.f32.gmra.mxu2 %vm475_vm0, %v564_v32 }
  0x7c   : > { %1211 = vmatmul.msk.f32.gmra.mxu1 %vm475_vm0, %v519_v6 }
  0x7d   : > { %1207 = vmatmul.msk.f32.gmra.mxu0 %vm475_vm0, %v472_v7 }
  0x7f   : > { %1215 = vmatmul.msk.f32.gmra.mxu2 %vm475_vm0, %v565_v33 }
  0x84   : > { %1212 = vmatmul.msk.f32.gmra.mxu1 %vm475_vm0, %v520_v8 }
  0x85   : > { %1208 = vmatmul.msk.f32.gmra.mxu0 %vm475_vm0, %v473_v9 }
  0x87   : > { %1216 = vmatmul.msk.f32.gmra.mxu2 %vm475_vm0, %v566_v34 }
  0xe9   : > { %v551_v10 = vpop.f32.mrf.mxu1 }
  0xea   : > { %v505_v11 = vpop.f32.mrf.mxu0  ;;  %1217 = vmatpush.xpose.msk.msra.mxu3 %vm475_vm0, %v551_v10 }
  0xeb   : > { %v609_v12 = vmul.f32 0.17677669, %v505_v11 }
  0xed   : > { %1218 = vmatmul.msk.f32.vlgmr.msra.gmra.mxu3 %vm475_vm0, %v609_v12 }
  0xf1   : > { %v554_v13 = vpop.f32.mrf.mxu1 }
  0xf2   : > { %v508_v14 = vpop.f32.mrf.mxu0  ;;  %1219 = vmatpush.xpose.msk.msrb.mxu3 %vm475_vm0, %v554_v13  ;;  %v597_v40 = vpop.f32.mrf.mxu2 }
  0xf3   : > { %v610_v15 = vmul.f32 0.17677669, %v508_v14  ;;  %831 = vmatpush.msrb.mxu0 %v597_v40 }
  0xf5   : > { %1220 = vmatmul.msk.f32.vlgmr.msrb.gmra.mxu3 %vm475_vm0, %v610_v15 }
  0xf9   : > { %v557_v16 = vpop.f32.mrf.mxu1 }
  0xfa   : > { %v511_v17 = vpop.f32.mrf.mxu0  ;;  %1221 = vmatpush.xpose.msk.msra.mxu3 %vm475_vm0, %v557_v16  ;;  %v600_v56 = vpop.f32.mrf.mxu2 }
  0xfb   : > { %v611_v18 = vmul.f32 0.17677669, %v511_v17  ;;  %854 = vmatpush.msrb.mxu1 %v600_v56  ;;  %v1339_v56 = vld [vmem:[%s1998_s7] ss:$0 sm:$0xff] }
  0xfd   : > { %1222 = vmatmul.msk.f32.vlgmr.msra.gmra.mxu3 %vm475_vm0, %v611_v18 }
 0x101   : > { %v560_v19 = vpop.f32.mrf.mxu1 }
 0x102   : > { %v514_v20 = vpop.f32.mrf.mxu0  ;;  %1223 = vmatpush.xpose.msk.msrb.mxu3 %vm475_vm0, %v560_v19  ;;  %v603_v57 = vpop.f32.mrf.mxu2 }
 0x103   : > { %v612_v21 = vmul.f32 0.17677669, %v514_v20  ;;  %877 = vmatpush.msrb.mxu2 %v603_v57 }
 0x105   : > { %1224 = vmatmul.msk.f32.vlgmr.msrb.gmra.mxu3 %vm475_vm0, %v612_v21 }
 0x10a   : > { %v606_v63 = vpop.f32.mrf.mxu2 }
 0x10b   : > { %900 = vmatpush.msra.mxu3 %v606_v63 }
 0x170   : > { %v636_v24 = vpop.f32.mrf.mxu3 }
 0x171   : > { %v717_v25 = vsel %vm475_vm0, %v636_v24, -inf }
 0x172   : > { %718 = vmax.xlane.f32.xlu1 %v717_v25 }
 0x178   : > { %v662_v26 = vpop.f32.mrf.mxu3 }
 0x179   : > { %v720_v27 = vsel %vm475_vm0, %v662_v26, -inf }
 0x17a   : > { %721 = vmax.xlane.f32.xlu1 %v720_v27 }
 0x180   : > { %v688_v28 = vpop.f32.mrf.mxu3 }
 0x181   : > { %v723_v29 = vsel %vm475_vm0, %v688_v28, -inf }
 0x182   : > { %724 = vmax.xlane.f32.xlu0 %v723_v29 }
 0x188   : > { %v714_v30 = vpop.f32.mrf.mxu3 }
 0x189   : > { %v726_v31 = vsel %vm475_vm0, %v714_v30, -inf }
 0x18a   : > { %727 = vmax.xlane.f32.xlu0 %v726_v31 }
 0x1e5   : > { %v719_v35 = vpop.xlane.xlu1 %718 }
 0x1e6   : > { %v729_v36 = vsub.f32 %v636_v24, %v719_v35 }
 0x1e8   : > { %v733_v37 = vmul.f32 1.442695, %v729_v36 }
 0x1ea   : > { %1340 = vpow2.f32 %v733_v37 }
 0x1ed   : > { %v722_v38 = vpop.xlane.xlu1 %721 }
 0x1ee   : > { %v730_v39 = vsub.f32 %v662_v26, %v722_v38 }
 0x1f0   : > { %v1341_v41 = vpop.eup %1340  ;;  %v735_v42 = vmul.f32 1.442695, %v730_v39 }
 0x1f1   : > { %v741_v43 = vsel %vm475_vm0, %v1341_v41, 0.0 }
 0x1f2   : > { %1342 = vpow2.f32 %v735_v42  ;;  %742 = vadd.xlane.f32.xlu0 %v741_v43  ;;  %v905_v43 = vld [vmem:[#allocation13] sm:$0xff] }
 0x1f3   : > { %949 = vmatpush.msra.mxu1 %v905_v43 }
 0x1f5   : > { %v725_v44 = vpop.xlane.xlu0 %724 }
 0x1f6   : > { %v731_v45 = vsub.f32 %v688_v28, %v725_v44  ;;  %v907_v44 = vld [vmem:[#allocation13 + $0x8] sm:$0xff] }
 0x1f7   : > { %926 = vmatpush.msra.mxu0 %v907_v44 }
 0x1f8   : > { %v1931_v46 = vpop.eup %1342  ;;  %v737_v47 = vmul.f32 1.442695, %v731_v45  ;;  %v955_v45 = vld [vmem:[#allocation13 + $0x10] sm:$0xff] }
 0x1f9   : > { %v744_v48 = vsel %vm475_vm0, %v1931_v46, 0.0  ;;  %974 = vmatpush.msra.mxu2 %v955_v45 }
 0x1fa   : > { %1344 = vpow2.f32 %v737_v47  ;;  %745 = vadd.xlane.f32.xlu1 %v744_v48 }
 0x1fd   : > { %v728_v49 = vpop.xlane.xlu0 %727 }
 0x1fe   : > { %v732_v50 = vsub.f32 %v714_v30, %v728_v49 }
 0x200   : > { %v1935_v51 = vpop.eup %1344  ;;  %v739_v52 = vmul.f32 1.442695, %v732_v50 }
 0x201   : > { %v747_v53 = vsel %vm475_vm0, %v1935_v51, 0.0 }
 0x202   : > { %1346 = vpow2.f32 %v739_v52  ;;  %748 = vadd.xlane.f32.xlu2 %v747_v53 }
 0x208   : > { %v1939_v54 = vpop.eup %1346 }
 0x209   : > { %v750_v55 = vsel %vm475_vm0, %v1939_v54, 0.0 }
 0x20a   : > { %751 = vadd.xlane.f32.xlu2 %v750_v55 }
 0x265   : > { %v743_v58 = vpop.xlane.xlu0 %742 }
 0x266   : > { %1348 = vrcp.f32 %v743_v58  ;;  %v764_v1 = vand.u32 2147483648, %v743_v58  ;;  %v762_v2 = vand.u32 2147483647, %v743_v58  ;;  %vm758_vm2 = vweird.f32 %v743_v58 }
 0x268   : > { %v765_v6 = vor.u32 1.1754944e-38, %v764_v1  ;;  %vm763_vm4 = vcmp.eq.f32.partialorder %v762_v2, 8.507059e+37 }
 0x26c   : > { %v1349_v59 = vpop.eup %1348 }
 0x26d   : > { %v754_v60 = vmul.f32 %v1349_v59, %v743_v58  ;;  %v746_v61 = vpop.xlane.xlu1 %745  ;;  %vm759_vm1 = vweird.f32 %v1349_v59 }
 0x26e   : > { %1350 = vrcp.f32 %v746_v61  ;;  %vm760_vm3 = vmor %vm758_vm2, %vm759_vm1  ;;  %v779_v13 = vand.u32 2147483648, %v746_v61  ;;  %v777_v14 = vand.u32 2147483647, %v746_v61  ;;  %vm773_vm6 = vweird.f32 %v746_v61 }
 0x26f   : > { %v755_v62 = vsub.f32 1.0, %v754_v60 }
 0x270   : > { %v780_v18 = vor.u32 1.1754944e-38, %v779_v13  ;;  %vm778_vm8 = vcmp.eq.f32.partialorder %v777_v14, 8.507059e+37 }
 0x271   : > { %v756_v0 = vmul.f32 %v1349_v59, %v755_v62 }
 0x273   : > { %v757_v3 = vadd.f32 %v1349_v59, %v756_v0 }
 0x274   : > { %v1351_v4 = vpop.eup %1350 }
 0x275   : > { %v761_v5 = vsel %vm760_vm3, %v1349_v59, %v757_v3  ;;  %v769_v7 = vmul.f32 %v1351_v4, %v746_v61  ;;  %v749_v8 = vpop.xlane.xlu2 %748  ;;  %vm774_vm5 = vweird.f32 %v1351_v4 }
 0x276   : > { %1352 = vrcp.f32 %v749_v8  ;;  %v766_v10 = vsel %vm763_vm4, %v765_v6, %v761_v5  ;;  %vm775_vm7 = vmor %vm773_vm6, %vm774_vm5  ;;  %v794_v23 = vand.u32 2147483648, %v749_v8  ;;  %v792_v26 = vand.u32 2147483647, %v749_v8 }
 0x277   : > { %v770_v9 = vsub.f32 1.0, %v769_v7  ;;  %v767_v11 = vmul.f32 %v1341_v41, %v766_v10  ;;  %vm788_vm10 = vweird.f32 %v749_v8 }
 0x278   : > { %v795_v29 = vor.u32 1.1754944e-38, %v794_v23  ;;  %vm793_vm12 = vcmp.eq.f32.partialorder %v792_v26, 8.507059e+37 }
 0x279   : > { %v771_v12 = vmul.f32 %v1351_v4, %v770_v9  ;;  %1225 = vmatmul.msk.f32.vlgmr.msrb.gmra.mxu0 %vm475_vm0, %v767_v11 }
 0x27b   : > { %v772_v15 = vadd.f32 %v1351_v4, %v771_v12 }
 0x27c   : > { %v1353_v16 = vpop.eup %1352 }
 0x27d   : > { %v776_v17 = vsel %vm775_vm7, %v1351_v4, %v772_v15  ;;  %v784_v19 = vmul.f32 %v1353_v16, %v749_v8  ;;  %v752_v20 = vpop.xlane.xlu2 %751  ;;  %vm789_vm9 = vweird.f32 %v1353_v16 }
 0x27e   : > { %1354 = vrcp.f32 %v752_v20  ;;  %v781_v22 = vsel %vm778_vm8, %v780_v18, %v776_v17  ;;  %vm790_vm11 = vmor %vm788_vm10, %vm789_vm9  ;;  %v809_v35 = vand.u32 2147483648, %v752_v20  ;;  %v807_v37 = vand.u32 2147483647, %v752_v20 }
 0x27f   : > { %v785_v21 = vsub.f32 1.0, %v784_v19  ;;  %v782_v24 = vmul.f32 %v1931_v46, %v781_v22  ;;  %vm803_vm14 = vweird.f32 %v752_v20  ;;  %v981_v46 = vld [vmem:[#allocation13 + $0x18] sm:$0xff] }
 0x280   : > { %v810_v39 = vor.u32 1.1754944e-38, %v809_v35  ;;  %vm808_vm1 = vcmp.eq.f32.partialorder %v807_v37, 8.507059e+37  ;;  %1000 = vmatpush.msrb.mxu3 %v981_v46 }
 0x281   : > { %v786_v25 = vmul.f32 %v1353_v16, %v785_v21  ;;  %1226 = vmatmul.msk.f32.vlgmr.msrb.gmra.mxu1 %vm475_vm0, %v782_v24 }
 0x283   : > { %v787_v27 = vadd.f32 %v1353_v16, %v786_v25 }
 0x284   : > { %v1355_v28 = vpop.eup %1354 }
 0x285   : > { %v799_v30 = vmul.f32 %v1355_v28, %v752_v20  ;;  %v791_v31 = vsel %vm790_vm11, %v1353_v16, %v787_v27  ;;  %vm804_vm13 = vweird.f32 %v1355_v28 }
 0x286   : > { %v796_v32 = vsel %vm793_vm12, %v795_v29, %v791_v31  ;;  %vm805_vm15 = vmor %vm803_vm14, %vm804_vm13 }
 0x287   : > { %v800_v33 = vsub.f32 1.0, %v799_v30  ;;  %v797_v34 = vmul.f32 %v1935_v51, %v796_v32 }
 0x289   : > { %v801_v36 = vmul.f32 %v1355_v28, %v800_v33  ;;  %1227 = vmatmul.msk.f32.vlgmr.msrb.gmra.mxu2 %vm475_vm0, %v797_v34 }
 0x28b   : > { %v802_v38 = vadd.f32 %v1355_v28, %v801_v36 }
 0x28d   : > { %v806_v40 = vsel %vm805_vm15, %v1355_v28, %v802_v38 }
 0x28e   : > { %v811_v41 = vsel %vm808_vm1, %v810_v39, %v806_v40 }
 0x28f   : > { %v812_v42 = vmul.f32 %v1939_v54, %v811_v41 }
 0x291   : > { %1228 = vmatmul.msk.f32.vlgmr.msra.gmra.mxu3 %vm475_vm0, %v812_v42 }
 0x2f6   : > { %v833_v47 = vpop.f32.mrf.mxu0 }
 0x2f7   : > { %1230 = vmatmul.msk.f32.vlgmr.msra.gmra.mxu1 %vm475_vm0, %v833_v47 }
 0x2fe   : > { %v856_v48 = vpop.f32.mrf.mxu1 }
 0x2ff   : > { %1229 = vmatmul.msk.f32.vlgmr.msra.gmra.mxu0 %vm475_vm0, %v856_v48 }
 0x30c   : > { %v879_v49 = vpop.f32.mrf.mxu2 }
 0x30d   : > { %1231 = vmatmul.msk.f32.vlgmr.msra.gmra.mxu2 %vm475_vm0, %v879_v49 }
 0x314   : > { %v902_v50 = vpop.f32.mrf.mxu3 }
 0x315   : > { %1232 = vmatmul.msk.f32.vlgmr.msrb.gmra.mxu3 %vm475_vm0, %v902_v50  ;;  %vm1011_vm0 = vcmask 261120  }
 0x374   : > { %v951_v52 = vpop.f32.mrf.mxu1 }
 0x37c   : > { %v928_v51 = vpop.f32.mrf.mxu0 }
 0x37d   : > { %v952_v54 = vadd.f32 %v951_v52, %v928_v51 }
 0x390   : > { %v976_v53 = vpop.f32.mrf.mxu2 }
 0x391   : > { %v979_v55 = vadd.f32 %v976_v53, %v952_v54 }
 0x398   : > { %v1002_v57 = vpop.f32.mrf.mxu3 }
 0x399   : > { %v1005_v58 = vadd.f32 %v1002_v57, %v979_v55 }
 0x39b   : > { %v1010_v59 = vadd.f32 %v1339_v56, %v1005_v58 }
 0x39d   : > { %1012 = vst.msk [vmem:[%s466_s22] sm:$0xff] %vm1011_vm0, %v1010_v59 }
 0x39e   : > { %1593 = shalt.err (!%p1590_p13)
}
 0x39f   : > { %1262 = dma.vmem_to_hbm [thread:$0]  (%p1771_p3), %s1027_s3, 128, %s1029_s26, %s1014_s9  }
 0x3a0 PF: > { %s2029_s17 = sld [smem:[#allocation20_spill]] }
 0x3a1   : > { %s2031_s15 = sld [smem:[#allocation21_spill]] }
 0x3a6   : > { %s1040_s19 = sand.u32 1, %s2029_s17  }
 0x3a7   : > { %p2032_p0 = scmp.ge.s32.totalorder %s2031_s15, 2  ;;  %s1041_s11 = scalar_lea.sflag [#allocation4], %s1040_s19 }
 0x3a9   : > { %p1288_p8 = pnand %p2032_p0, %p1732_p6 }
 0x3ab   : > { %p1289_p10 = pneg %p1288_p8 }
 0x3ad   : > { %1627 = dma.done.wait (%p1289_p10), %s1041_s11, 128  }
 0x3ae   : > { %1629 = vsyncadd (%p1289_p10), %s1041_s11, 4294967168  ;;  %s2033_s30 = sld [smem:[#allocation23_spill]]  ;;  %s2035_s27 = smov %s1636_s28 }
 0x3af   : > { %s2034_s20 = sld [smem:[#allocation24_spill]]  ;;  %s2036_s28 = smov %s1640_s29 }
 0x3b4   : > { %p26_p12 = scmp.ge.s32.totalorder %s2033_s30, 4  }
 0x3b5   : > { %s2037_s29 = smov %s2034_s20 }
 0x3b6   :  { %28 = sbr.rel (!%p26_p12) target bundleno = 13 (0xd), region = 140 }
 0x3bb   :  { %1047 = vsyncpa [#allocation3], 1 }
 0x3bc   :  { %1049 = vsyncpa [#allocation3 + $0x1], 1 }
 0x3bd   :  { %1050 = vsyncpa [#allocation6], 1 }
 0x3be   :  { %1052 = vsyncpa [#allocation6 + $0x1], 1 }
 0x3bf   :  { %1053 = vsyncpa [#allocation9], 1 }
 0x3c0   :  { %1054 = vsyncpa [#allocation12], 1 }
 0x3c1   :  { %1055 = vsyncpa [#allocation4], 1 }
 0x3c2   :  { %1057 = vsyncpa [#allocation4 + $0x1], 1 }

</bundles_post_ra>
